<compile_context>
chip_gen: v6e
topology: v6e:2x2x1
jax: 0.10.0
libtpu: 0.0.40
codegen_flags: <defaults>
</compile_context>

<pallas_src>
import jax
import jax.numpy as jnp
from jax.experimental import pallas as pl
from jax.experimental.pallas import tpu as pltpu

LANE = 128  # TPU vreg lane width


def _round_up(a, b):
    return (a + b - 1) // b * b


# ---------------------------------------------------------------------------
# Kernels
# ---------------------------------------------------------------------------
def _resblock_kernel_shortcut(x_ref, w0_ref, b0_ref, w1_ref, b1_ref,
                              ws_ref, bs_ref, o_ref):
    x = x_ref[...]                       # keep native dtype for MXU operands
    xr = jnp.maximum(x, 0)               # relu(x), main branch only
    h = jnp.dot(xr, w0_ref[...], preferred_element_type=jnp.float32)
    h = h + b0_ref[...].astype(jnp.float32)
    h = jnp.maximum(h, 0.0)
    h = jnp.dot(h.astype(w1_ref.dtype), w1_ref[...],
                preferred_element_type=jnp.float32)
    h = h + b1_ref[...].astype(jnp.float32)
    # shortcut branch (size_in != size_out) uses the *raw* residual x
    res = jnp.dot(x, ws_ref[...], preferred_element_type=jnp.float32)
    res = res + bs_ref[...].astype(jnp.float32)
    o_ref[...] = (h + res).astype(o_ref.dtype)


def _resblock_kernel_identity(x_ref, w0_ref, b0_ref, w1_ref, b1_ref, o_ref):
    x = x_ref[...]
    xr = jnp.maximum(x, 0)
    h = jnp.dot(xr, w0_ref[...], preferred_element_type=jnp.float32)
    h = h + b0_ref[...].astype(jnp.float32)
    h = jnp.maximum(h, 0.0)
    h = jnp.dot(h.astype(w1_ref.dtype), w1_ref[...],
                preferred_element_type=jnp.float32)
    h = h + b1_ref[...].astype(jnp.float32)
    o_ref[...] = (h + x.astype(jnp.float32)).astype(o_ref.dtype)


# ---------------------------------------------------------------------------
# Wrapper
# ---------------------------------------------------------------------------
def _auto_block_rows(n, size_in_p, size_h_p, size_out_p, x_itemsize,
                     weight_bytes, row_align):
    """Largest row tile that keeps tiles + resident weights comfortably in VMEM."""
    budget = 40 * (1 << 20) - weight_bytes          # target well under 64 MiB (v7x)
    budget = max(budget, 4 * (1 << 20))
    per_row = (2 * (size_in_p + size_out_p) * x_itemsize   # double-buffered x / out
               + 4 * (size_h_p + 2 * size_out_p))          # f32 intermediates
    br = budget // max(per_row, 1)
    br = max(row_align, min(1024, (br // row_align) * row_align))
    return min(br, _round_up(n, row_align))


def resnet_block_fc(x, params, *, block_rows=None):
    """Apply ResnetBlockFC to x of shape (..., size_in)."""
    w0, b0, w1, b1 = params["w0"], params["b0"], params["w1"], params["b1"]
    size_in, size_h = w0.shape
    size_out = w1.shape[1]
    has_shortcut = "ws" in params

    orig_shape = x.shape
    x2 = x.reshape(-1, size_in)
    n = x2.shape[0]

    # ----- lane-dense padding of all feature axes to multiples of 128 -------
    size_in_p = _round_up(size_in, LANE)
    size_h_p = _round_up(size_h, LANE)
    size_out_p = _round_up(size_out, LANE)

    x_itemsize = x.dtype.itemsize
    w_itemsize = w0.dtype.itemsize
    # sublane packing: 8 rows for 32-bit, 16 for 16-bit, 32 for 8-bit dtypes
    row_align = 8 * max(1, 4 // x_itemsize)

    weight_elems = size_in_p * size_h_p + size_h_p * size_out_p
    bias_elems = size_h_p + size_out_p
    if has_shortcut:
        weight_elems += size_in_p * size_out_p
        bias_elems += size_out_p

    if block_rows is None:
        block_rows = _auto_block_rows(n, size_in_p, size_h_p, size_out_p,
                                      x_itemsize, 2 * weight_elems * w_itemsize,
                                      row_align)
    else:
        block_rows = max(row_align, _round_up(block_rows, row_align))
        block_rows = min(block_rows, _round_up(n, row_align))
    n_pad = _round_up(n, block_rows)

    def pad2(a, r, c):
        return jnp.pad(a, ((0, r - a.shape[0]), (0, c - a.shape[1])))

    # Padding is cheap/fused here; in a real model pad the weights once ahead
    # of time and only pad x per call.
    x_p = pad2(x2, n_pad, size_in_p)
    w0_p = pad2(w0, size_in_p, size_h_p)
    b0_p = pad2(b0.reshape(1, -1), 1, size_h_p)
    w1_p = pad2(w1, size_h_p, size_out_p)
    b1_p = pad2(b1.reshape(1, -1), 1, size_out_p)
    args = [x_p, w0_p, b0_p, w1_p, b1_p]

    if has_shortcut:
        args += [pad2(params["ws"], size_in_p, size_out_p),
                 pad2(params["bs"].reshape(1, -1), 1, size_out_p)]
        kernel = _resblock_kernel_shortcut
    else:
        kernel = _resblock_kernel_identity

    grid = (n_pad // block_rows,)
    row = lambda i: (i, 0)
    full = lambda i: (0, 0)

    flops = 2 * n_pad * (size_in_p * size_h_p + size_h_p * size_out_p
                         + (size_in_p * size_out_p if has_shortcut else 0))
    bytes_accessed = (n_pad * size_in_p * x_itemsize
                      + (weight_elems + bias_elems) * w_itemsize
                      + n_pad * size_out_p * x_itemsize)
    cost = pl.CostEstimate(flops=flops, transcendentals=0,
                           bytes_accessed=int(bytes_accessed))

    def build(single_buffer_weights):
        if single_buffer_weights:
            # Weights/biases never change block index: keep one resident copy.
            wspec = lambda shp: pl.BlockSpec(shp, full,
                                             pipeline_mode=pl.Buffered(1))
            wbuf = 1
        else:
            wspec = lambda shp: pl.BlockSpec(shp, full)
            wbuf = 2

        in_specs = [
            pl.BlockSpec((block_rows, size_in_p), row),
            wspec((size_in_p, size_h_p)),
            wspec((1, size_h_p)),
            wspec((size_h_p, size_out_p)),
            wspec((1, size_out_p)),
        ]
        if has_shortcut:
            in_specs += [wspec((size_in_p, size_out_p)),
                         wspec((1, size_out_p))]

        vmem_needed = (
            2 * block_rows * (size_in_p + size_out_p) * x_itemsize   # x/out pipeline bufs
            + 4 * block_rows * (size_h_p + 2 * size_out_p)           # f32 intermediates
            + wbuf * (weight_elems + bias_elems) * w_itemsize)       # resident weights
        vmem_limit = int(min(max(int(vmem_needed * 1.5) + (2 << 20), 16 << 20),
                             64 << 20))

        return pl.pallas_call(
            kernel,
            out_shape=jax.ShapeDtypeStruct((n_pad, size_out_p), x.dtype),
            grid_spec=pltpu.PrefetchScalarGridSpec(
                num_scalar_prefetch=0,
                grid=grid,
                in_specs=in_specs,
                out_specs=pl.BlockSpec((block_rows, size_out_p), row),
            ),
            compiler_params=pltpu.CompilerParams(
                dimension_semantics=("parallel",),   # row blocks shard across TCs
                vmem_limit_bytes=vmem_limit),
            cost_estimate=cost,
        )

    try:
        out = build(single_buffer_weights=True)(*args)
    except Exception:
        # pipeline_mode / pl.Buffered not supported here -> default double buffering.
        out = build(single_buffer_weights=False)(*args)

    out = out[:n, :size_out]
    return out.reshape(orig_shape[:-1] + (size_out,))


# ---------------------------------------------------------------------------
# Reference + init (weights stored as (in, out) = PyTorch (out, in) transposed)
# ---------------------------------------------------------------------------
def init_params(key, size_in, size_out=None, size_h=None, dtype=jnp.float32):
    if size_out is None:
        size_out = size_in
    if size_h is None:
        size_h = min(size_in, size_out)
    k0, k1, k2, k3, k4 = jax.random.split(key, 5)
    params = {
        "w0": jax.random.normal(k0, (size_in, size_h), dtype) * 0.1,
        "b0": jax.random.normal(k1, (size_h,), dtype) * 0.1,
        "w1": jnp.zeros((size_h, size_out), dtype),   # nn.init.zeros_(fc_1.weight)
        "b1": jax.random.normal(k2, (size_out,), dtype) * 0.1,
    }
    if size_in != size_out:
        params["ws"] = jax.random.normal(k3, (size_in, size_out), dtype) * 0.1
        params["bs"] = jax.random.normal(k4, (size_out,), dtype) * 0.1
    return params


def resnet_block_fc_ref(x, params):
    h = jnp.maximum(x, 0.0) @ params["w0"] + params["b0"]
    h = jnp.maximum(h, 0.0) @ params["w1"] + params["b1"]
    res = x @ params["ws"] + params["bs"] if "ws" in params else x
    return h + res


if __name__ == "__main__":
    key = jax.random.PRNGKey(0)
    kx, kp1, kp2, kp3, kw = jax.random.split(key, 5)

    # Case 1: f32, size_in != size_out (linear shortcut), zero-init fc_1 weight.
    B, T, size_in, size_h, size_out = 2, 8, 32, 16, 64
    x = jax.random.normal(kx, (B, T, size_in), jnp.float32)
    params = init_params(kp1, size_in, size_out, size_h)
    out = jax.block_until_ready(resnet_block_fc(x, params))
    ref = resnet_block_fc_ref(x, params)
    assert out.shape == (B, T, size_out)
    assert jnp.allclose(out, ref, atol=1e-5, rtol=1e-5)

    # Case 2: f32, identity shortcut, ragged row count (exercises row padding),
    #         non-zero fc_1 weight to exercise the second matmul.
    x2 = jax.random.normal(kx, (2, 7, size_in), jnp.float32)
    params2 = init_params(kp2, size_in)
    params2["w1"] = jax.random.normal(kw, params2["w1"].shape, jnp.float32) * 0.1
    out2 = jax.block_until_ready(resnet_block_fc(x2, params2))
    ref2 = resnet_block_fc_ref(x2, params2)
    assert out2.shape == (2, 7, size_in)
    assert jnp.allclose(out2, ref2, atol=1e-4, rtol=1e-4)

    # Case 3: bf16 operands on the MXU with f32 accumulation.
    xb = x.astype(jnp.bfloat16)
    params3 = jax.tree_util.tree_map(
        lambda a: a.astype(jnp.bfloat16), init_params(kp3, size_in, size_out, size_h))
    out3 = jax.block_until_ready(resnet_block_fc(xb, params3))
    ref3 = resnet_block_fc_ref(
        xb.astype(jnp.float32),
        jax.tree_util.tree_map(lambda a: a.astype(jnp.float32), params3))
    assert out3.dtype == jnp.bfloat16
    assert jnp.allclose(out3.astype(jnp.float32), ref3, atol=5e-2, rtol=5e-2)

    print("KERNEL_OK")
</pallas_src>

<mosaic_0001>
module attributes {stable_mosaic.version = 11 : i64} {
  func.func @_resblock_kernel_shortcut(%arg0: i32, %arg1: memref<16x128xf32, #tpu.memory_space<vmem>>, %arg2: memref<128x128xf32, #tpu.memory_space<vmem>>, %arg3: memref<1x128xf32, #tpu.memory_space<vmem>>, %arg4: memref<128x128xf32, #tpu.memory_space<vmem>>, %arg5: memref<1x128xf32, #tpu.memory_space<vmem>>, %arg6: memref<128x128xf32, #tpu.memory_space<vmem>>, %arg7: memref<1x128xf32, #tpu.memory_space<vmem>>, %arg8: memref<16x128xf32, #tpu.memory_space<vmem>>) attributes {dimension_semantics = [#tpu.dimension_semantics<parallel>], iteration_bounds = array<i64: 1>, scalar_prefetch = 0 : i64, scratch_operands = 0 : i64, tpu.core_type = #tpu.core_type<tc>, window_params = [{transform_indices = @transform_0, window_bounds = array<i64: 16, 128>}, {pipeline_mode = #tpu.pipeline_mode<synchronous>, transform_indices = @transform_1, window_bounds = array<i64: 128, 128>}, {pipeline_mode = #tpu.pipeline_mode<synchronous>, transform_indices = @transform_2, window_bounds = array<i64: 1, 128>}, {pipeline_mode = #tpu.pipeline_mode<synchronous>, transform_indices = @transform_3, window_bounds = array<i64: 128, 128>}, {pipeline_mode = #tpu.pipeline_mode<synchronous>, transform_indices = @transform_4, window_bounds = array<i64: 1, 128>}, {pipeline_mode = #tpu.pipeline_mode<synchronous>, transform_indices = @transform_5, window_bounds = array<i64: 128, 128>}, {pipeline_mode = #tpu.pipeline_mode<synchronous>, transform_indices = @transform_6, window_bounds = array<i64: 1, 128>}, {transform_indices = @transform_7, window_bounds = array<i64: 16, 128>}]} {
    %c0 = arith.constant 0 : index
    %c0_0 = arith.constant 0 : index
    %0 = vector.load %arg1[%c0, %c0_0] : memref<16x128xf32, #tpu.memory_space<vmem>>, vector<16x128xf32>
    %cst = arith.constant 0.000000e+00 : f32
    %1 = vector.broadcast %cst : f32 to vector<16x128xf32>
    %2 = arith.maximumf %0, %1 : vector<16x128xf32>
    %c0_1 = arith.constant 0 : index
    %c0_2 = arith.constant 0 : index
    %3 = vector.load %arg2[%c0_1, %c0_2] : memref<128x128xf32, #tpu.memory_space<vmem>>, vector<128x128xf32>
    %cst_3 = arith.constant dense<0.000000e+00> : vector<16x128xf32>
    %4 = tpu.matmul %2, %3, %cst_3 {dimension_numbers = #tpu.dot_dimension_numbers<[1], [0], [0], [1], [0, 0, 1, 1], [], []>} : vector<16x128xf32>, vector<128x128xf32>, vector<16x128xf32> -> vector<16x128xf32>
    %c0_4 = arith.constant 0 : index
    %c0_5 = arith.constant 0 : index
    %5 = vector.load %arg3[%c0_4, %c0_5] : memref<1x128xf32, #tpu.memory_space<vmem>>, vector<1x128xf32>
    %6 = vector.broadcast %5 : vector<1x128xf32> to vector<16x128xf32>
    %7 = arith.addf %4, %6 : vector<16x128xf32>
    %cst_6 = arith.constant 0.000000e+00 : f32
    %8 = vector.broadcast %cst_6 : f32 to vector<16x128xf32>
    %9 = arith.maximumf %7, %8 : vector<16x128xf32>
    %c0_7 = arith.constant 0 : index
    %c0_8 = arith.constant 0 : index
    %10 = vector.load %arg4[%c0_7, %c0_8] : memref<128x128xf32, #tpu.memory_space<vmem>>, vector<128x128xf32>
    %cst_9 = arith.constant dense<0.000000e+00> : vector<16x128xf32>
    %11 = tpu.matmul %9, %10, %cst_9 {dimension_numbers = #tpu.dot_dimension_numbers<[1], [0], [0], [1], [0, 0, 1, 1], [], []>} : vector<16x128xf32>, vector<128x128xf32>, vector<16x128xf32> -> vector<16x128xf32>
    %c0_10 = arith.constant 0 : index
    %c0_11 = arith.constant 0 : index
    %12 = vector.load %arg5[%c0_10, %c0_11] : memref<1x128xf32, #tpu.memory_space<vmem>>, vector<1x128xf32>
    %13 = vector.broadcast %12 : vector<1x128xf32> to vector<16x128xf32>
    %14 = arith.addf %11, %13 : vector<16x128xf32>
    %c0_12 = arith.constant 0 : index
    %c0_13 = arith.constant 0 : index
    %15 = vector.load %arg6[%c0_12, %c0_13] : memref<128x128xf32, #tpu.memory_space<vmem>>, vector<128x128xf32>
    %cst_14 = arith.constant dense<0.000000e+00> : vector<16x128xf32>
    %16 = tpu.matmul %0, %15, %cst_14 {dimension_numbers = #tpu.dot_dimension_numbers<[1], [0], [0], [1], [0, 0, 1, 1], [], []>} : vector<16x128xf32>, vector<128x128xf32>, vector<16x128xf32> -> vector<16x128xf32>
    %c0_15 = arith.constant 0 : index
    %c0_16 = arith.constant 0 : index
    %17 = vector.load %arg7[%c0_15, %c0_16] : memref<1x128xf32, #tpu.memory_space<vmem>>, vector<1x128xf32>
    %18 = vector.broadcast %17 : vector<1x128xf32> to vector<16x128xf32>
    %19 = arith.addf %16, %18 : vector<16x128xf32>
    %20 = arith.addf %14, %19 : vector<16x128xf32>
    %c0_17 = arith.constant 0 : index
    %c0_18 = arith.constant 0 : index
    %21 = vector.load %arg8[%c0_17, %c0_18] : memref<16x128xf32, #tpu.memory_space<vmem>>, vector<16x128xf32>
    tpu.vector_store %arg8[%c0_17, %c0_18], %20 {strides = array<i32>} : memref<16x128xf32, #tpu.memory_space<vmem>>, vector<16x128xf32>,
    return
  }
  func.func @transform_0(%arg0: i32) -> (i32, i32) {
    %c0_i32 = arith.constant 0 : i32
    %c0_i32_0 = arith.constant 0 : i32
    return %arg0, %c0_i32 : i32, i32
  }
  func.func @transform_1(%arg0: i32) -> (i32, i32) {
    %c0_i32 = arith.constant 0 : i32
    %c0_i32_0 = arith.constant 0 : i32
    %c0_i32_1 = arith.constant 0 : i32
    return %c0_i32, %c0_i32_0 : i32, i32
  }
  func.func @transform_2(%arg0: i32) -> (i32, i32) {
    %c0_i32 = arith.constant 0 : i32
    %c0_i32_0 = arith.constant 0 : i32
    %c0_i32_1 = arith.constant 0 : i32
    return %c0_i32, %c0_i32_0 : i32, i32
  }
  func.func @transform_3(%arg0: i32) -> (i32, i32) {
    %c0_i32 = arith.constant 0 : i32
    %c0_i32_0 = arith.constant 0 : i32
    %c0_i32_1 = arith.constant 0 : i32
    return %c0_i32, %c0_i32_0 : i32, i32
  }
  func.func @transform_4(%arg0: i32) -> (i32, i32) {
    %c0_i32 = arith.constant 0 : i32
    %c0_i32_0 = arith.constant 0 : i32
    %c0_i32_1 = arith.constant 0 : i32
    return %c0_i32, %c0_i32_0 : i32, i32
  }
  func.func @transform_5(%arg0: i32) -> (i32, i32) {
    %c0_i32 = arith.constant 0 : i32
    %c0_i32_0 = arith.constant 0 : i32
    %c0_i32_1 = arith.constant 0 : i32
    return %c0_i32, %c0_i32_0 : i32, i32
  }
  func.func @transform_6(%arg0: i32) -> (i32, i32) {
    %c0_i32 = arith.constant 0 : i32
    %c0_i32_0 = arith.constant 0 : i32
    %c0_i32_1 = arith.constant 0 : i32
    return %c0_i32, %c0_i32_0 : i32, i32
  }
  func.func @transform_7(%arg0: i32) -> (i32, i32) {
    %c0_i32 = arith.constant 0 : i32
    %c0_i32_0 = arith.constant 0 : i32
    return %arg0, %c0_i32 : i32, i32
  }
}

module attributes {stable_mosaic.version = 11 : i64} {
  func.func @_resblock_kernel_shortcut(%arg0: i32, %arg1: memref<16x128xf32, #tpu.memory_space<vmem>>, %arg2: memref<128x128xf32, #tpu.memory_space<vmem>>, %arg3: memref<1x128xf32, #tpu.memory_space<vmem>>, %arg4: memref<128x128xf32, #tpu.memory_space<vmem>>, %arg5: memref<1x128xf32, #tpu.memory_space<vmem>>, %arg6: memref<128x128xf32, #tpu.memory_space<vmem>>, %arg7: memref<1x128xf32, #tpu.memory_space<vmem>>, %arg8: memref<16x128xf32, #tpu.memory_space<vmem>>) attributes {dimension_semantics = [#tpu.dimension_semantics<parallel>], iteration_bounds = array<i64: 1>, scalar_prefetch = 0 : i64, scratch_operands = 0 : i64, tpu.core_type = #tpu.core_type<tc>, window_params = [{transform_indices = @transform_0, window_bounds = array<i64: 16, 128>}, {pipeline_mode = #tpu.pipeline_mode<synchronous>, transform_indices = @transform_1, window_bounds = array<i64: 128, 128>}, {pipeline_mode = #tpu.pipeline_mode<synchronous>, transform_indices = @transform_2, window_bounds = array<i64: 1, 128>}, {pipeline_mode = #tpu.pipeline_mode<synchronous>, transform_indices = @transform_3, window_bounds = array<i64: 128, 128>}, {pipeline_mode = #tpu.pipeline_mode<synchronous>, transform_indices = @transform_4, window_bounds = array<i64: 1, 128>}, {pipeline_mode = #tpu.pipeline_mode<synchronous>, transform_indices = @transform_5, window_bounds = array<i64: 128, 128>}, {pipeline_mode = #tpu.pipeline_mode<synchronous>, transform_indices = @transform_6, window_bounds = array<i64: 1, 128>}, {transform_indices = @transform_7, window_bounds = array<i64: 16, 128>}]} {
    %c0 = arith.constant 0 : index
    %c0_0 = arith.constant 0 : index
    %0 = vector.load %arg1[%c0, %c0_0] : memref<16x128xf32, #tpu.memory_space<vmem>>, vector<16x128xf32>
    %cst = arith.constant 0.000000e+00 : f32
    %1 = vector.broadcast %cst : f32 to vector<16x128xf32>
    %2 = arith.maximumf %0, %1 : vector<16x128xf32>
    %c0_1 = arith.constant 0 : index
    %c0_2 = arith.constant 0 : index
    %3 = vector.load %arg2[%c0_1, %c0_2] : memref<128x128xf32, #tpu.memory_space<vmem>>, vector<128x128xf32>
    %cst_3 = arith.constant dense<0.000000e+00> : vector<16x128xf32>
    %4 = tpu.matmul %2, %3, %cst_3 {dimension_numbers = #tpu.dot_dimension_numbers<[1], [0], [0], [1], [0, 0, 1, 1], [], []>} : vector<16x128xf32>, vector<128x128xf32>, vector<16x128xf32> -> vector<16x128xf32>
    %c0_4 = arith.constant 0 : index
    %c0_5 = arith.constant 0 : index
    %5 = vector.load %arg3[%c0_4, %c0_5] : memref<1x128xf32, #tpu.memory_space<vmem>>, vector<1x128xf32>
    %6 = vector.broadcast %5 : vector<1x128xf32> to vector<16x128xf32>
    %7 = arith.addf %4, %6 : vector<16x128xf32>
    %cst_6 = arith.constant 0.000000e+00 : f32
    %8 = vector.broadcast %cst_6 : f32 to vector<16x128xf32>
    %9 = arith.maximumf %7, %8 : vector<16x128xf32>
    %c0_7 = arith.constant 0 : index
    %c0_8 = arith.constant 0 : index
    %10 = vector.load %arg4[%c0_7, %c0_8] : memref<128x128xf32, #tpu.memory_space<vmem>>, vector<128x128xf32>
    %cst_9 = arith.constant dense<0.000000e+00> : vector<16x128xf32>
    %11 = tpu.matmul %9, %10, %cst_9 {dimension_numbers = #tpu.dot_dimension_numbers<[1], [0], [0], [1], [0, 0, 1, 1], [], []>} : vector<16x128xf32>, vector<128x128xf32>, vector<16x128xf32> -> vector<16x128xf32>
    %c0_10 = arith.constant 0 : index
    %c0_11 = arith.constant 0 : index
    %12 = vector.load %arg5[%c0_10, %c0_11] : memref<1x128xf32, #tpu.memory_space<vmem>>, vector<1x128xf32>
    %13 = vector.broadcast %12 : vector<1x128xf32> to vector<16x128xf32>
    %14 = arith.addf %11, %13 : vector<16x128xf32>
    %c0_12 = arith.constant 0 : index
    %c0_13 = arith.constant 0 : index
    %15 = vector.load %arg6[%c0_12, %c0_13] : memref<128x128xf32, #tpu.memory_space<vmem>>, vector<128x128xf32>
    %cst_14 = arith.constant dense<0.000000e+00> : vector<16x128xf32>
    %16 = tpu.matmul %0, %15, %cst_14 {dimension_numbers = #tpu.dot_dimension_numbers<[1], [0], [0], [1], [0, 0, 1, 1], [], []>} : vector<16x128xf32>, vector<128x128xf32>, vector<16x128xf32> -> vector<16x128xf32>
    %c0_15 = arith.constant 0 : index
    %c0_16 = arith.constant 0 : index
    %17 = vector.load %arg7[%c0_15, %c0_16] : memref<1x128xf32, #tpu.memory_space<vmem>>, vector<1x128xf32>
    %18 = vector.broadcast %17 : vector<1x128xf32> to vector<16x128xf32>
    %19 = arith.addf %16, %18 : vector<16x128xf32>
    %20 = arith.addf %14, %19 : vector<16x128xf32>
    %c0_17 = arith.constant 0 : index
    %c0_18 = arith.constant 0 : index
    %21 = vector.load %arg8[%c0_17, %c0_18] : memref<16x128xf32, #tpu.memory_space<vmem>>, vector<16x128xf32>
    tpu.vector_store %arg8[%c0_17, %c0_18], %20 {strides = array<i32>} : memref<16x128xf32, #tpu.memory_space<vmem>>, vector<16x128xf32>,
    return
  }
  func.func @transform_0(%arg0: i32) -> (i32, i32) {
    %c0_i32 = arith.constant 0 : i32
    %c0_i32_0 = arith.constant 0 : i32
    return %arg0, %c0_i32 : i32, i32
  }
  func.func @transform_1(%arg0: i32) -> (i32, i32) {
    %c0_i32 = arith.constant 0 : i32
    %c0_i32_0 = arith.constant 0 : i32
    %c0_i32_1 = arith.constant 0 : i32
    return %c0_i32, %c0_i32_0 : i32, i32
  }
  func.func @transform_2(%arg0: i32) -> (i32, i32) {
    %c0_i32 = arith.constant 0 : i32
    %c0_i32_0 = arith.constant 0 : i32
    %c0_i32_1 = arith.constant 0 : i32
    return %c0_i32, %c0_i32_0 : i32, i32
  }
  func.func @transform_3(%arg0: i32) -> (i32, i32) {
    %c0_i32 = arith.constant 0 : i32
    %c0_i32_0 = arith.constant 0 : i32
    %c0_i32_1 = arith.constant 0 : i32
    return %c0_i32, %c0_i32_0 : i32, i32
  }
  func.func @transform_4(%arg0: i32) -> (i32, i32) {
    %c0_i32 = arith.constant 0 : i32
    %c0_i32_0 = arith.constant 0 : i32
    %c0_i32_1 = arith.constant 0 : i32
    return %c0_i32, %c0_i32_0 : i32, i32
  }
  func.func @transform_5(%arg0: i32) -> (i32, i32) {
    %c0_i32 = arith.constant 0 : i32
    %c0_i32_0 = arith.constant 0 : i32
    %c0_i32_1 = arith.constant 0 : i32
    return %c0_i32, %c0_i32_0 : i32, i32
  }
  func.func @transform_6(%arg0: i32) -> (i32, i32) {
    %c0_i32 = arith.constant 0 : i32
    %c0_i32_0 = arith.constant 0 : i32
    %c0_i32_1 = arith.constant 0 : i32
    return %c0_i32, %c0_i32_0 : i32, i32
  }
  func.func @transform_7(%arg0: i32) -> (i32, i32) {
    %c0_i32 = arith.constant 0 : i32
    %c0_i32_0 = arith.constant 0 : i32
    return %arg0, %c0_i32 : i32, i32
  }
}

</mosaic_0001>

<bundles_post_ra>
// kernel: tpu_custom_call.1
= control target key start
LH: loop header
LB: loop body
LE: loop exit
PB: predicated region body
PF: predicated region fallthrough
CT: control target
= control target key end

     0   :  { %12 = vsyncpa [#allocation3], 0  ;;  %s776_s0 = inlined_call_operand.hbm [shape: f32[16,128], index: 0, kind: input, shape index: {}]   ;;  %s777_s1 = inlined_call_operand.hbm [shape: f32[128,128], index: 1, kind: input, shape index: {}]   ;;  %s778_s2 = inlined_call_operand.vmem [shape: f32[1,128], index: 2, kind: input, shape index: {}]   ;;  %s779_s3 = inlined_call_operand.hbm [shape: f32[128,128], index: 3, kind: input, shape index: {}]   ;;  %s780_s4 = inlined_call_operand.vmem [shape: f32[1,128], index: 4, kind: input, shape index: {}]   ;;  %s781_s5 = inlined_call_operand.hbm [shape: f32[128,128], index: 5, kind: input, shape index: {}]   ;;  %s782_s6 = inlined_call_operand.vmem [shape: f32[1,128], index: 6, kind: input, shape index: {}]   ;;  %s783_s7 = inlined_call_operand.hbm [shape: f32[16,128], index: 7, kind: output, shape index: {}]  }
   0x1   :  { %13 = vsyncpa [#allocation6], 0 }
   0x2   :  { %14 = vsyncpa [#allocation9], 0 }
   0x3   :  { %15 = vsyncpa [#allocation4], 0  ;;  %s682_s24 = smov [#allocation5]   ;;  %s683_s26 = smov [#allocation2]  }
   0x4   :  { %s33_s25 = sshll.u32 %s682_s24, 4  ;;  %s21_s27 = sshll.u32 %s683_s26, 4  ;;  %s34_s25 = int_to_ptr.vmem [resolvable:$true] %s33_s25  ;;  %s22_s27 = int_to_ptr.vmem [resolvable:$true] %s21_s27 }
   0x5   :  { %s582_s28 = scalar_lea.vmem %s34_s25, 2048  ;;  %p587_p1 = scmp.lt.s32.totalorder %s34_s25, %s34_s25 }
   0x6   :  { %p583_p0 = scmp.ne.s32.totalorder %s34_s25, %s582_s28  ;;  %p588_p2 = scmp.lt.s32.totalorder %s582_s28, %s582_s28 }
   0x8   :  { %p589_p3 = por %p588_p2, %p587_p1 }
   0xa   :  { %p590_p4 = pnand %p589_p3, %p583_p0 }
   0xc   :  { %593 = shalt.err (!%p590_p4)
}
   0xd   :  { %s684_s29 = smov 128   ;;  %s685_s30 = smov 8  }
   0xe   :  { %39 = dma.hbm_to_vmem [thread:$0]  %s777_s1, 2048, %s34_s25, [#allocation6], %s684_s29, %s684_s29, %s685_s30  }
   0xf   :  { %s602_s10 = scalar_lea.vmem %s22_s27, 256  ;;  %p607_p6 = scmp.lt.s32.totalorder %s22_s27, %s22_s27 }
  0x10   :  { %p603_p5 = scmp.ne.s32.totalorder %s22_s27, %s602_s10  ;;  %p608_p7 = scmp.lt.s32.totalorder %s602_s10, %s602_s10 }
  0x12   :  { %p609_p8 = por %p608_p7, %p607_p6 }
  0x14   :  { %p610_p9 = pnand %p609_p8, %p603_p5 }
  0x16   :  { %613 = shalt.err (!%p610_p9)
}
  0x17   :  { %27 = dma.hbm_to_vmem [thread:$0]  %s776_s0, 256, %s22_s27, [#allocation3], %s684_s29, %s684_s29, %s685_s30  }
  0x18   :  { %s686_s13 = smov [#allocation7]   ;;  %s687_s15 = smov [#allocation8]  }
  0x19   :  { %s47_s14 = sshll.u32 %s686_s13, 4  ;;  %s61_s16 = sshll.u32 %s687_s15, 4  ;;  %s48_s14 = int_to_ptr.vmem [resolvable:$true] %s47_s14  ;;  %s62_s16 = int_to_ptr.vmem [resolvable:$true] %s61_s16 }
  0x1a   :  { %s622_s1 = scalar_lea.vmem %s48_s14, 2048  ;;  %p627_p11 = scmp.lt.s32.totalorder %s48_s14, %s48_s14 }
  0x1b   :  { %p623_p10 = scmp.ne.s32.totalorder %s48_s14, %s622_s1  ;;  %p628_p12 = scmp.lt.s32.totalorder %s622_s1, %s622_s1 }
  0x1d   :  { %p629_p13 = por %p628_p12, %p627_p11 }
  0x1f   :  { %p630_p0 = pnand %p629_p13, %p623_p10 }
  0x21   :  { %633 = shalt.err (!%p630_p0)
}
  0x22   :  { %53 = dma.hbm_to_vmem [thread:$0]  %s779_s3, 2048, %s48_s14, [#allocation6], %s684_s29, %s684_s29, %s685_s30  }
  0x23   :  { %s642_s0 = scalar_lea.vmem %s62_s16, 2048  ;;  %p647_p2 = scmp.lt.s32.totalorder %s62_s16, %s62_s16 }
  0x24   :  { %p643_p1 = scmp.ne.s32.totalorder %s62_s16, %s642_s0  ;;  %p648_p3 = scmp.lt.s32.totalorder %s642_s0, %s642_s0 }
  0x26   :  { %p649_p4 = por %p648_p3, %p647_p2 }
  0x28   :  { %p650_p5 = pnand %p649_p4, %p643_p1 }
  0x2a   :  { %653 = shalt.err (!%p650_p5)
}
  0x2b   :  { %67 = dma.hbm_to_vmem [thread:$0]  %s781_s5, 2048, %s62_s16, [#allocation9], %s684_s29, %s684_s29, %s685_s30  }
  0x2c   :  { %674 = dma.done.wait [#allocation3], 256  }
  0x2d   :  { %675 = vsyncadd [#allocation3], 4294967040 }
  0x2e   :  { %676 = dma.done.wait [#allocation6], 4096  }
  0x2f   :  { %677 = vsyncadd [#allocation6], 4294963200 }
  0x30   :  { %678 = dma.done.wait [#allocation9], 2048  }
  0x31   :  { %679 = vsyncadd [#allocation9], 4294965248  ;;  %v101_v0 = vld [vmem:[#allocation5 + $0x78] sm:$0xff]  ;;  %v100_v1 = vld [vmem:[#allocation5 + $0x70] sm:$0xff] }
  0x32   :  { %462 = vmatprep.subr.mxu0 %v101_v0  ;;  %v99_v2 = vld [vmem:[#allocation5 + $0x68] sm:$0xff]  ;;  %v98_v3 = vld [vmem:[#allocation5 + $0x60] sm:$0xff]  ;;  %v753_v4 = vld [vmem:[#allocation2] sm:$0xff] }
  0x33   :  { %463 = vmatpush3.msra.mxu0 %v101_v0  ;;  %v97_v5 = vld [vmem:[#allocation5 + $0x58] sm:$0xff]  ;;  %v84_v6 = vmax.f32 %v753_v4, 0.0  ;;  %v200_v8 = vld [vmem:[#allocation7 + $0x70] sm:$0xff]  ;;  %v199_v10 = vld [vmem:[#allocation7 + $0x68] sm:$0xff] }
  0x34   :  { %464 = vmatprep.subr.mxu0 %v100_v1  ;;  %v201_v7 = vld [vmem:[#allocation7 + $0x78] sm:$0xff]  ;;  %v96_v9 = vld [vmem:[#allocation5 + $0x50] sm:$0xff]  ;;  %v95_v11 = vld [vmem:[#allocation5 + $0x48] sm:$0xff] }
  0x35   :  { %465 = vmatpush3.msra.mxu0 %v100_v1  ;;  %497 = vmatprep.subr.mxu1 %v201_v7  ;;  %v198_v12 = vld [vmem:[#allocation7 + $0x60] sm:$0xff]  ;;  %v197_v14 = vld [vmem:[#allocation7 + $0x58] sm:$0xff]  ;;  %v196_v16 = vld [vmem:[#allocation7 + $0x50] sm:$0xff] }
  0x36   :  { %466 = vmatprep.subr.mxu0 %v99_v2  ;;  %494 = vmatprep.mubr.f32.mxu0 %v84_v6  ;;  %v94_v13 = vld [vmem:[#allocation5 + $0x40] sm:$0xff]  ;;  %v93_v15 = vld [vmem:[#allocation5 + $0x38] sm:$0xff]  ;;  %v92_v17 = vld [vmem:[#allocation5 + $0x30] sm:$0xff] }
  0x37   :  { %467 = vmatpush3.msra.mxu0 %v99_v2  ;;  %498 = vmatpush3.msra.mxu1 %v201_v7  ;;  %v195_v18 = vld [vmem:[#allocation7 + $0x48] sm:$0xff]  ;;  %v194_v20 = vld [vmem:[#allocation7 + $0x40] sm:$0xff]  ;;  %v193_v22 = vld [vmem:[#allocation7 + $0x38] sm:$0xff] }
  0x38   :  { %468 = vmatprep.subr.mxu0 %v98_v3  ;;  %499 = vmatprep.subr.mxu1 %v200_v8  ;;  %v91_v19 = vld [vmem:[#allocation5 + $0x28] sm:$0xff]  ;;  %v90_v21 = vld [vmem:[#allocation5 + $0x20] sm:$0xff]  ;;  %v89_v23 = vld [vmem:[#allocation5 + $0x18] sm:$0xff] }
  0x39   :  { %469 = vmatpush3.msra.mxu0 %v98_v3  ;;  %500 = vmatpush3.msra.mxu1 %v200_v8  ;;  %v192_v24 = vld [vmem:[#allocation7 + $0x30] sm:$0xff]  ;;  %v191_v26 = vld [vmem:[#allocation7 + $0x28] sm:$0xff]  ;;  %v756_v28 = vld [vmem:[#allocation2 + $0x8] sm:$0xff] }
  0x3a   :  { %470 = vmatprep.subr.mxu0 %v97_v5  ;;  %501 = vmatprep.subr.mxu1 %v199_v10  ;;  %v88_v25 = vld [vmem:[#allocation5 + $0x10] sm:$0xff]  ;;  %v87_v27 = vld [vmem:[#allocation5 + $0x8] sm:$0xff]  ;;  %v190_v29 = vld [vmem:[#allocation7 + $0x20] sm:$0xff]  ;;  %v85_v31 = vmax.f32 %v756_v28, 0.0 }
  0x3b   :  { %471 = vmatpush3.msra.mxu0 %v97_v5  ;;  %502 = vmatpush3.msra.mxu1 %v199_v10  ;;  %v86_v30 = vld [vmem:[#allocation5] sm:$0xff]  ;;  %v299_v32 = vld [vmem:[#allocation8 + $0x78] sm:$0xff]  ;;  %v298_v33 = vld [vmem:[#allocation8 + $0x70] sm:$0xff] }
  0x3c   :  { %472 = vmatprep.subr.mxu0 %v96_v9  ;;  %503 = vmatprep.subr.mxu1 %v198_v12  ;;  %v297_v34 = vld [vmem:[#allocation8 + $0x68] sm:$0xff]  ;;  %v296_v35 = vld [vmem:[#allocation8 + $0x60] sm:$0xff]  ;;  %v295_v36 = vld [vmem:[#allocation8 + $0x58] sm:$0xff] }
  0x3d   :  { %473 = vmatpush3.msra.mxu0 %v96_v9  ;;  %504 = vmatpush3.msra.mxu1 %v198_v12  ;;  %v294_v37 = vld [vmem:[#allocation8 + $0x50] sm:$0xff]  ;;  %v293_v38 = vld [vmem:[#allocation8 + $0x48] sm:$0xff]  ;;  %v292_v39 = vld [vmem:[#allocation8 + $0x40] sm:$0xff] }
  0x3e   :  { %474 = vmatprep.subr.mxu0 %v95_v11  ;;  %505 = vmatprep.subr.mxu1 %v197_v14  ;;  %v291_v40 = vld [vmem:[#allocation8 + $0x38] sm:$0xff]  ;;  %v290_v41 = vld [vmem:[#allocation8 + $0x30] sm:$0xff]  ;;  %v289_v42 = vld [vmem:[#allocation8 + $0x28] sm:$0xff] }
  0x3f   :  { %475 = vmatpush3.msra.mxu0 %v95_v11  ;;  %506 = vmatpush3.msra.mxu1 %v197_v14  ;;  %v288_v43 = vld [vmem:[#allocation8 + $0x20] sm:$0xff]  ;;  %v287_v44 = vld [vmem:[#allocation8 + $0x18] sm:$0xff]  ;;  %v286_v46 = vld [vmem:[#allocation8 + $0x10] sm:$0xff] }
  0x40   :  { %476 = vmatprep.subr.mxu0 %v94_v13  ;;  %507 = vmatprep.subr.mxu1 %v196_v16  ;;  %v189_v45 = vld [vmem:[#allocation7 + $0x18] sm:$0xff]  ;;  %v188_v47 = vld [vmem:[#allocation7 + $0x10] sm:$0xff]  ;;  %v285_v48 = vld [vmem:[#allocation8 + $0x8] sm:$0xff] }
  0x41   :  { %477 = vmatpush3.msra.mxu0 %v94_v13  ;;  %508 = vmatpush3.msra.mxu1 %v196_v16  ;;  %v187_v49 = vld [vmem:[#allocation7 + $0x8] sm:$0xff]  ;;  %v284_v50 = vld [vmem:[#allocation8] sm:$0xff]  ;;  %v405_v52 = vld [vmem:[%s778_s2] ss:$0 sm:$0xff]  ;;  %s688_s2 = smov [#allocation10]  }
  0x42   :  { %478 = vmatprep.subr.mxu0 %v93_v15  ;;  %509 = vmatprep.subr.mxu1 %v195_v18  ;;  %v186_v51 = vld [vmem:[#allocation7] sm:$0xff]  ;;  %v407_v60 = vld [vmem:[%s782_s6] ss:$0 sm:$0xff]  ;;  %s391_s25 = sshll.u32 %s688_s2, 4  ;;  %s392_s25 = int_to_ptr.vmem [resolvable:$true] %s391_s25 }
  0x43   :  { %479 = vmatpush3.msra.mxu0 %v93_v15  ;;  %510 = vmatpush3.msra.mxu1 %v195_v18  ;;  %v406_v61 = vld [vmem:[%s780_s4] ss:$0 sm:$0xff]  ;;  %s654_s26 = scalar_lea.vmem %s392_s25, 256  ;;  %p659_p7 = scmp.lt.s32.totalorder %s392_s25, %s392_s25 }
  0x44   :  { %480 = vmatprep.subr.mxu0 %v92_v17  ;;  %511 = vmatprep.subr.mxu1 %v194_v20  ;;  %p655_p6 = scmp.ne.s32.totalorder %s392_s25, %s654_s26  ;;  %p660_p8 = scmp.lt.s32.totalorder %s654_s26, %s654_s26 }
  0x45   :  { %481 = vmatpush3.msra.mxu0 %v92_v17  ;;  %512 = vmatpush3.msra.mxu1 %v194_v20 }
  0x46   :  { %482 = vmatprep.subr.mxu0 %v91_v19  ;;  %513 = vmatprep.subr.mxu1 %v193_v22  ;;  %p661_p9 = por %p660_p8, %p659_p7 }
  0x47   :  { %483 = vmatpush3.msra.mxu0 %v91_v19  ;;  %514 = vmatpush3.msra.mxu1 %v193_v22 }
  0x48   :  { %484 = vmatprep.subr.mxu0 %v90_v21  ;;  %515 = vmatprep.subr.mxu1 %v192_v24  ;;  %p662_p10 = pnand %p661_p9, %p655_p6 }
  0x49   :  { %485 = vmatpush3.msra.mxu0 %v90_v21  ;;  %516 = vmatpush3.msra.mxu1 %v192_v24 }
  0x4a   :  { %486 = vmatprep.subr.mxu0 %v89_v23  ;;  %517 = vmatprep.subr.mxu1 %v191_v26 }
  0x4b   :  { %487 = vmatpush3.msra.mxu0 %v89_v23  ;;  %518 = vmatpush3.msra.mxu1 %v191_v26 }
  0x4c   :  { %488 = vmatprep.subr.mxu0 %v88_v25  ;;  %519 = vmatprep.subr.mxu1 %v190_v29 }
  0x4d   :  { %489 = vmatpush3.msra.mxu0 %v88_v25  ;;  %520 = vmatpush3.msra.mxu1 %v190_v29 }
  0x4e   :  { %490 = vmatprep.subr.mxu0 %v87_v27  ;;  %521 = vmatprep.subr.mxu1 %v189_v45 }
  0x4f   :  { %491 = vmatpush3.msra.mxu0 %v87_v27  ;;  %522 = vmatpush3.msra.mxu1 %v189_v45 }
  0x50   :  { %492 = vmatprep.subr.mxu0 %v86_v30  ;;  %523 = vmatprep.subr.mxu1 %v188_v47 }
  0x51   :  { %493 = vmatpush3.msra.mxu0 %v86_v30  ;;  %524 = vmatpush3.msra.mxu1 %v188_v47 }
  0x52   :  { %495 = vmatmul.mubr.f32.vlgmr.msra.gmra.mxu0 %v85_v31  ;;  %532 = vmatprep.subr.mxu0 %v299_v32 }
  0x53   :  { %533 = vmatpush3.msra.mxu0 %v299_v32  ;;  %564 = vmatprep.mubr.f32.mxu0 %v753_v4 }
  0x54   :  { %534 = vmatprep.subr.mxu0 %v298_v33  ;;  %525 = vmatprep.subr.mxu1 %v187_v49 }
  0x55   :  { %535 = vmatpush3.msra.mxu0 %v298_v33  ;;  %526 = vmatpush3.msra.mxu1 %v187_v49 }
  0x56   :  { %536 = vmatprep.subr.mxu0 %v297_v34  ;;  %527 = vmatprep.subr.mxu1 %v186_v51 }
  0x57   :  { %537 = vmatpush3.msra.mxu0 %v297_v34  ;;  %528 = vmatpush3.msra.mxu1 %v186_v51 }
  0x58   :  { %538 = vmatprep.subr.mxu0 %v296_v35 }
  0x59   :  { %539 = vmatpush3.msra.mxu0 %v296_v35 }
  0x5a   :  { %540 = vmatprep.subr.mxu0 %v295_v36 }
  0x5b   :  { %541 = vmatpush3.msra.mxu0 %v295_v36 }
  0x5c   :  { %542 = vmatprep.subr.mxu0 %v294_v37 }
  0x5d   :  { %543 = vmatpush3.msra.mxu0 %v294_v37 }
  0x5e   :  { %544 = vmatprep.subr.mxu0 %v293_v38 }
  0x5f   :  { %545 = vmatpush3.msra.mxu0 %v293_v38 }
  0x60   :  { %546 = vmatprep.subr.mxu0 %v292_v39 }
  0x61   :  { %547 = vmatpush3.msra.mxu0 %v292_v39 }
  0x62   :  { %548 = vmatprep.subr.mxu0 %v291_v40 }
  0x63   :  { %549 = vmatpush3.msra.mxu0 %v291_v40 }
  0x64   :  { %550 = vmatprep.subr.mxu0 %v290_v41 }
  0x65   :  { %551 = vmatpush3.msra.mxu0 %v290_v41 }
  0x66   :  { %552 = vmatprep.subr.mxu0 %v289_v42 }
  0x67   :  { %553 = vmatpush3.msra.mxu0 %v289_v42 }
  0x68   :  { %554 = vmatprep.subr.mxu0 %v288_v43 }
  0x69   :  { %555 = vmatpush3.msra.mxu0 %v288_v43 }
  0x6a   :  { %556 = vmatprep.subr.mxu0 %v287_v44 }
  0x6b   :  { %557 = vmatpush3.msra.mxu0 %v287_v44 }
  0x6c   :  { %558 = vmatprep.subr.mxu0 %v286_v46 }
  0x6d   :  { %559 = vmatpush3.msra.mxu0 %v286_v46 }
  0x6e   :  { %560 = vmatprep.subr.mxu0 %v285_v48 }
  0x6f   :  { %561 = vmatpush3.msra.mxu0 %v285_v48 }
  0x70   :  { %562 = vmatprep.subr.mxu0 %v284_v50 }
  0x71   :  { %563 = vmatpush3.msra.mxu0 %v284_v50 }
  0x72   :  { %565 = vmatmul.mubr.f32.vlgmr.msra.gmra.mxu0 %v756_v28 }
 0x112   :  { %v496_v53 = vpop.f32.mrf.mxu0 }
 0x113   :  { %v181_v54 = vadd.f32 %v496_v53, %v405_v52 }
 0x114   :  { %v175_v55 = vpop.f32.mrf.mxu0 }
 0x115   :  { %v176_v56 = vadd.f32 %v405_v52, %v175_v55  ;;  %v185_v58 = vmax.f32 %v181_v54, 0.0 }
 0x117   :  { %v184_v57 = vmax.f32 %v176_v56, 0.0 }
 0x119   :  { %529 = vmatprep.mubr.f32.mxu1 %v184_v57 }
 0x11a   :  { %530 = vmatmul.mubr.f32.vlgmr.msra.gmra.mxu1 %v185_v58 }
 0x132   :  { %v566_v59 = vpop.f32.mrf.mxu0 }
 0x133   :  { %v379_v62 = vadd.f32 %v566_v59, %v407_v60 }
 0x134   :  { %v373_v0 = vpop.f32.mrf.mxu0 }
 0x135   :  { %v374_v4 = vadd.f32 %v407_v60, %v373_v0 }
 0x1da   :  { %v531_v63 = vpop.f32.mrf.mxu1 }
 0x1db   :  { %v281_v1 = vadd.f32 %v531_v63, %v406_v61 }
 0x1dc   :  { %v275_v2 = vpop.f32.mrf.mxu1 }
 0x1dd   :  { %v383_v3 = vadd.f32 %v379_v62, %v281_v1  ;;  %v276_v5 = vadd.f32 %v406_v61, %v275_v2 }
 0x1df   :  { %385 = vst [vmem:[#allocation10 + $0x8] sm:$0xff] %v383_v3  ;;  %v382_v6 = vadd.f32 %v374_v4, %v276_v5 }
 0x1e1   :  { %384 = vst [vmem:[#allocation10] sm:$0xff] %v382_v6 }
 0x1e2   :  { %665 = shalt.err (!%p662_p10)
}
 0x1e3   :  { %397 = dma.vmem_to_hbm [thread:$0]  %s392_s25, 256, %s783_s7, [#allocation4], %s684_s29, %s684_s29, %s685_s30  }
 0x1e4   :  { %680 = dma.done.wait [#allocation4], 256  }
 0x1e5   :  { %681 = vsyncadd [#allocation4], 4294967040 }
 0x1e6   :  { %401 = vsyncpa [#allocation3], 1 }
 0x1e7   :  { %402 = vsyncpa [#allocation6], 1 }
 0x1e8   :  { %403 = vsyncpa [#allocation9], 1 }
 0x1e9   :  { %404 = vsyncpa [#allocation4], 1 }

// kernel: tpu_custom_call.1
= control target key start
LH: loop header
LB: loop body
LE: loop exit
PB: predicated region body
PF: predicated region fallthrough
CT: control target
= control target key end

     0   :  { %12 = vsyncpa [#allocation3], 0  ;;  %s776_s0 = inlined_call_operand.hbm [shape: f32[16,128], index: 0, kind: input, shape index: {}]   ;;  %s777_s1 = inlined_call_operand.hbm [shape: f32[128,128], index: 1, kind: input, shape index: {}]   ;;  %s778_s2 = inlined_call_operand.vmem [shape: f32[1,128], index: 2, kind: input, shape index: {}]   ;;  %s779_s3 = inlined_call_operand.hbm [shape: f32[128,128], index: 3, kind: input, shape index: {}]   ;;  %s780_s4 = inlined_call_operand.vmem [shape: f32[1,128], index: 4, kind: input, shape index: {}]   ;;  %s781_s5 = inlined_call_operand.hbm [shape: f32[128,128], index: 5, kind: input, shape index: {}]   ;;  %s782_s6 = inlined_call_operand.vmem [shape: f32[1,128], index: 6, kind: input, shape index: {}]   ;;  %s783_s7 = inlined_call_operand.hbm [shape: f32[16,128], index: 7, kind: output, shape index: {}]  }
   0x1   :  { %13 = vsyncpa [#allocation6], 0 }
   0x2   :  { %14 = vsyncpa [#allocation9], 0 }
   0x3   :  { %15 = vsyncpa [#allocation4], 0  ;;  %s682_s24 = smov [#allocation5]   ;;  %s683_s26 = smov [#allocation2]  }
   0x4   :  { %s33_s25 = sshll.u32 %s682_s24, 4  ;;  %s21_s27 = sshll.u32 %s683_s26, 4  ;;  %s34_s25 = int_to_ptr.vmem [resolvable:$true] %s33_s25  ;;  %s22_s27 = int_to_ptr.vmem [resolvable:$true] %s21_s27 }
   0x5   :  { %s582_s28 = scalar_lea.vmem %s34_s25, 2048  ;;  %p587_p1 = scmp.lt.s32.totalorder %s34_s25, %s34_s25 }
   0x6   :  { %p583_p0 = scmp.ne.s32.totalorder %s34_s25, %s582_s28  ;;  %p588_p2 = scmp.lt.s32.totalorder %s582_s28, %s582_s28 }
   0x8   :  { %p589_p3 = por %p588_p2, %p587_p1 }
   0xa   :  { %p590_p4 = pnand %p589_p3, %p583_p0 }
   0xc   :  { %593 = shalt.err (!%p590_p4)
}
   0xd   :  { %s684_s29 = smov 128   ;;  %s685_s30 = smov 8  }
   0xe   :  { %39 = dma.hbm_to_vmem [thread:$0]  %s777_s1, 2048, %s34_s25, [#allocation6], %s684_s29, %s684_s29, %s685_s30  }
   0xf   :  { %s602_s10 = scalar_lea.vmem %s22_s27, 256  ;;  %p607_p6 = scmp.lt.s32.totalorder %s22_s27, %s22_s27 }
  0x10   :  { %p603_p5 = scmp.ne.s32.totalorder %s22_s27, %s602_s10  ;;  %p608_p7 = scmp.lt.s32.totalorder %s602_s10, %s602_s10 }
  0x12   :  { %p609_p8 = por %p608_p7, %p607_p6 }
  0x14   :  { %p610_p9 = pnand %p609_p8, %p603_p5 }
  0x16   :  { %613 = shalt.err (!%p610_p9)
}
  0x17   :  { %27 = dma.hbm_to_vmem [thread:$0]  %s776_s0, 256, %s22_s27, [#allocation3], %s684_s29, %s684_s29, %s685_s30  }
  0x18   :  { %s686_s13 = smov [#allocation7]   ;;  %s687_s15 = smov [#allocation8]  }
  0x19   :  { %s47_s14 = sshll.u32 %s686_s13, 4  ;;  %s61_s16 = sshll.u32 %s687_s15, 4  ;;  %s48_s14 = int_to_ptr.vmem [resolvable:$true] %s47_s14  ;;  %s62_s16 = int_to_ptr.vmem [resolvable:$true] %s61_s16 }
  0x1a   :  { %s622_s1 = scalar_lea.vmem %s48_s14, 2048  ;;  %p627_p11 = scmp.lt.s32.totalorder %s48_s14, %s48_s14 }
  0x1b   :  { %p623_p10 = scmp.ne.s32.totalorder %s48_s14, %s622_s1  ;;  %p628_p12 = scmp.lt.s32.totalorder %s622_s1, %s622_s1 }
  0x1d   :  { %p629_p13 = por %p628_p12, %p627_p11 }
  0x1f   :  { %p630_p0 = pnand %p629_p13, %p623_p10 }
  0x21   :  { %633 = shalt.err (!%p630_p0)
}
  0x22   :  { %53 = dma.hbm_to_vmem [thread:$0]  %s779_s3, 2048, %s48_s14, [#allocation6], %s684_s29, %s684_s29, %s685_s30  }
  0x23   :  { %s642_s0 = scalar_lea.vmem %s62_s16, 2048  ;;  %p647_p2 = scmp.lt.s32.totalorder %s62_s16, %s62_s16 }
  0x24   :  { %p643_p1 = scmp.ne.s32.totalorder %s62_s16, %s642_s0  ;;  %p648_p3 = scmp.lt.s32.totalorder %s642_s0, %s642_s0 }
  0x26   :  { %p649_p4 = por %p648_p3, %p647_p2 }
  0x28   :  { %p650_p5 = pnand %p649_p4, %p643_p1 }
  0x2a   :  { %653 = shalt.err (!%p650_p5)
}
  0x2b   :  { %67 = dma.hbm_to_vmem [thread:$0]  %s781_s5, 2048, %s62_s16, [#allocation9], %s684_s29, %s684_s29, %s685_s30  }
  0x2c   :  { %674 = dma.done.wait [#allocation3], 256  }
  0x2d   :  { %675 = vsyncadd [#allocation3], 4294967040 }
  0x2e   :  { %676 = dma.done.wait [#allocation6], 4096  }
  0x2f   :  { %677 = vsyncadd [#allocation6], 4294963200 }
  0x30   :  { %678 = dma.done.wait [#allocation9], 2048  }
  0x31   :  { %679 = vsyncadd [#allocation9], 4294965248  ;;  %v101_v0 = vld [vmem:[#allocation5 + $0x78] sm:$0xff]  ;;  %v100_v1 = vld [vmem:[#allocation5 + $0x70] sm:$0xff] }
  0x32   :  { %462 = vmatprep.subr.mxu0 %v101_v0  ;;  %v99_v2 = vld [vmem:[#allocation5 + $0x68] sm:$0xff]  ;;  %v98_v3 = vld [vmem:[#allocation5 + $0x60] sm:$0xff]  ;;  %v753_v4 = vld [vmem:[#allocation2] sm:$0xff] }
  0x33   :  { %463 = vmatpush3.msra.mxu0 %v101_v0  ;;  %v97_v5 = vld [vmem:[#allocation5 + $0x58] sm:$0xff]  ;;  %v84_v6 = vmax.f32 %v753_v4, 0.0  ;;  %v200_v8 = vld [vmem:[#allocation7 + $0x70] sm:$0xff]  ;;  %v199_v10 = vld [vmem:[#allocation7 + $0x68] sm:$0xff] }
  0x34   :  { %464 = vmatprep.subr.mxu0 %v100_v1  ;;  %v201_v7 = vld [vmem:[#allocation7 + $0x78] sm:$0xff]  ;;  %v96_v9 = vld [vmem:[#allocation5 + $0x50] sm:$0xff]  ;;  %v95_v11 = vld [vmem:[#allocation5 + $0x48] sm:$0xff] }
  0x35   :  { %465 = vmatpush3.msra.mxu0 %v100_v1  ;;  %497 = vmatprep.subr.mxu1 %v201_v7  ;;  %v198_v12 = vld [vmem:[#allocation7 + $0x60] sm:$0xff]  ;;  %v197_v14 = vld [vmem:[#allocation7 + $0x58] sm:$0xff]  ;;  %v196_v16 = vld [vmem:[#allocation7 + $0x50] sm:$0xff] }
  0x36   :  { %466 = vmatprep.subr.mxu0 %v99_v2  ;;  %494 = vmatprep.mubr.f32.mxu0 %v84_v6  ;;  %v94_v13 = vld [vmem:[#allocation5 + $0x40] sm:$0xff]  ;;  %v93_v15 = vld [vmem:[#allocation5 + $0x38] sm:$0xff]  ;;  %v92_v17 = vld [vmem:[#allocation5 + $0x30] sm:$0xff] }
  0x37   :  { %467 = vmatpush3.msra.mxu0 %v99_v2  ;;  %498 = vmatpush3.msra.mxu1 %v201_v7  ;;  %v195_v18 = vld [vmem:[#allocation7 + $0x48] sm:$0xff]  ;;  %v194_v20 = vld [vmem:[#allocation7 + $0x40] sm:$0xff]  ;;  %v193_v22 = vld [vmem:[#allocation7 + $0x38] sm:$0xff] }
  0x38   :  { %468 = vmatprep.subr.mxu0 %v98_v3  ;;  %499 = vmatprep.subr.mxu1 %v200_v8  ;;  %v91_v19 = vld [vmem:[#allocation5 + $0x28] sm:$0xff]  ;;  %v90_v21 = vld [vmem:[#allocation5 + $0x20] sm:$0xff]  ;;  %v89_v23 = vld [vmem:[#allocation5 + $0x18] sm:$0xff] }
  0x39   :  { %469 = vmatpush3.msra.mxu0 %v98_v3  ;;  %500 = vmatpush3.msra.mxu1 %v200_v8  ;;  %v192_v24 = vld [vmem:[#allocation7 + $0x30] sm:$0xff]  ;;  %v191_v26 = vld [vmem:[#allocation7 + $0x28] sm:$0xff]  ;;  %v756_v28 = vld [vmem:[#allocation2 + $0x8] sm:$0xff] }
  0x3a   :  { %470 = vmatprep.subr.mxu0 %v97_v5  ;;  %501 = vmatprep.subr.mxu1 %v199_v10  ;;  %v88_v25 = vld [vmem:[#allocation5 + $0x10] sm:$0xff]  ;;  %v87_v27 = vld [vmem:[#allocation5 + $0x8] sm:$0xff]  ;;  %v190_v29 = vld [vmem:[#allocation7 + $0x20] sm:$0xff]  ;;  %v85_v31 = vmax.f32 %v756_v28, 0.0 }
  0x3b   :  { %471 = vmatpush3.msra.mxu0 %v97_v5  ;;  %502 = vmatpush3.msra.mxu1 %v199_v10  ;;  %v86_v30 = vld [vmem:[#allocation5] sm:$0xff]  ;;  %v299_v32 = vld [vmem:[#allocation8 + $0x78] sm:$0xff]  ;;  %v298_v33 = vld [vmem:[#allocation8 + $0x70] sm:$0xff] }
  0x3c   :  { %472 = vmatprep.subr.mxu0 %v96_v9  ;;  %503 = vmatprep.subr.mxu1 %v198_v12  ;;  %v297_v34 = vld [vmem:[#allocation8 + $0x68] sm:$0xff]  ;;  %v296_v35 = vld [vmem:[#allocation8 + $0x60] sm:$0xff]  ;;  %v295_v36 = vld [vmem:[#allocation8 + $0x58] sm:$0xff] }
  0x3d   :  { %473 = vmatpush3.msra.mxu0 %v96_v9  ;;  %504 = vmatpush3.msra.mxu1 %v198_v12  ;;  %v294_v37 = vld [vmem:[#allocation8 + $0x50] sm:$0xff]  ;;  %v293_v38 = vld [vmem:[#allocation8 + $0x48] sm:$0xff]  ;;  %v292_v39 = vld [vmem:[#allocation8 + $0x40] sm:$0xff] }
  0x3e   :  { %474 = vmatprep.subr.mxu0 %v95_v11  ;;  %505 = vmatprep.subr.mxu1 %v197_v14  ;;  %v291_v40 = vld [vmem:[#allocation8 + $0x38] sm:$0xff]  ;;  %v290_v41 = vld [vmem:[#allocation8 + $0x30] sm:$0xff]  ;;  %v289_v42 = vld [vmem:[#allocation8 + $0x28] sm:$0xff] }
  0x3f   :  { %475 = vmatpush3.msra.mxu0 %v95_v11  ;;  %506 = vmatpush3.msra.mxu1 %v197_v14  ;;  %v288_v43 = vld [vmem:[#allocation8 + $0x20] sm:$0xff]  ;;  %v287_v44 = vld [vmem:[#allocation8 + $0x18] sm:$0xff]  ;;  %v286_v46 = vld [vmem:[#allocation8 + $0x10] sm:$0xff] }
  0x40   :  { %476 = vmatprep.subr.mxu0 %v94_v13  ;;  %507 = vmatprep.subr.mxu1 %v196_v16  ;;  %v189_v45 = vld [vmem:[#allocation7 + $0x18] sm:$0xff]  ;;  %v188_v47 = vld [vmem:[#allocation7 + $0x10] sm:$0xff]  ;;  %v285_v48 = vld [vmem:[#allocation8 + $0x8] sm:$0xff] }
  0x41   :  { %477 = vmatpush3.msra.mxu0 %v94_v13  ;;  %508 = vmatpush3.msra.mxu1 %v196_v16  ;;  %v187_v49 = vld [vmem:[#allocation7 + $0x8] sm:$0xff]  ;;  %v284_v50 = vld [vmem:[#allocation8] sm:$0xff]  ;;  %v405_v52 = vld [vmem:[%s778_s2] ss:$0 sm:$0xff]  ;;  %s688_s2 = smov [#allocation10]  }
  0x42   :  { %478 = vmatprep.subr.mxu0 %v93_v15  ;;  %509 = vmatprep.subr.mxu1 %v195_v18  ;;  %v186_v51 = vld [vmem:[#allocation7] sm:$0xff]  ;;  %v407_v60 = vld [vmem:[%s782_s6] ss:$0 sm:$0xff]  ;;  %s391_s25 = sshll.u32 %s688_s2, 4  ;;  %s392_s25 = int_to_ptr.vmem [resolvable:$true] %s391_s25 }
  0x43   :  { %479 = vmatpush3.msra.mxu0 %v93_v15  ;;  %510 = vmatpush3.msra.mxu1 %v195_v18  ;;  %v406_v61 = vld [vmem:[%s780_s4] ss:$0 sm:$0xff]  ;;  %s654_s26 = scalar_lea.vmem %s392_s25, 256  ;;  %p659_p7 = scmp.lt.s32.totalorder %s392_s25, %s392_s25 }
  0x44   :  { %480 = vmatprep.subr.mxu0 %v92_v17  ;;  %511 = vmatprep.subr.mxu1 %v194_v20  ;;  %p655_p6 = scmp.ne.s32.totalorder %s392_s25, %s654_s26  ;;  %p660_p8 = scmp.lt.s32.totalorder %s654_s26, %s654_s26 }
  0x45   :  { %481 = vmatpush3.msra.mxu0 %v92_v17  ;;  %512 = vmatpush3.msra.mxu1 %v194_v20 }
  0x46   :  { %482 = vmatprep.subr.mxu0 %v91_v19  ;;  %513 = vmatprep.subr.mxu1 %v193_v22  ;;  %p661_p9 = por %p660_p8, %p659_p7 }
  0x47   :  { %483 = vmatpush3.msra.mxu0 %v91_v19  ;;  %514 = vmatpush3.msra.mxu1 %v193_v22 }
  0x48   :  { %484 = vmatprep.subr.mxu0 %v90_v21  ;;  %515 = vmatprep.subr.mxu1 %v192_v24  ;;  %p662_p10 = pnand %p661_p9, %p655_p6 }
  0x49   :  { %485 = vmatpush3.msra.mxu0 %v90_v21  ;;  %516 = vmatpush3.msra.mxu1 %v192_v24 }
  0x4a   :  { %486 = vmatprep.subr.mxu0 %v89_v23  ;;  %517 = vmatprep.subr.mxu1 %v191_v26 }
  0x4b   :  { %487 = vmatpush3.msra.mxu0 %v89_v23  ;;  %518 = vmatpush3.msra.mxu1 %v191_v26 }
  0x4c   :  { %488 = vmatprep.subr.mxu0 %v88_v25  ;;  %519 = vmatprep.subr.mxu1 %v190_v29 }
  0x4d   :  { %489 = vmatpush3.msra.mxu0 %v88_v25  ;;  %520 = vmatpush3.msra.mxu1 %v190_v29 }
  0x4e   :  { %490 = vmatprep.subr.mxu0 %v87_v27  ;;  %521 = vmatprep.subr.mxu1 %v189_v45 }
  0x4f   :  { %491 = vmatpush3.msra.mxu0 %v87_v27  ;;  %522 = vmatpush3.msra.mxu1 %v189_v45 }
  0x50   :  { %492 = vmatprep.subr.mxu0 %v86_v30  ;;  %523 = vmatprep.subr.mxu1 %v188_v47 }
  0x51   :  { %493 = vmatpush3.msra.mxu0 %v86_v30  ;;  %524 = vmatpush3.msra.mxu1 %v188_v47 }
  0x52   :  { %495 = vmatmul.mubr.f32.vlgmr.msra.gmra.mxu0 %v85_v31  ;;  %532 = vmatprep.subr.mxu0 %v299_v32 }
  0x53   :  { %533 = vmatpush3.msra.mxu0 %v299_v32  ;;  %564 = vmatprep.mubr.f32.mxu0 %v753_v4 }
  0x54   :  { %534 = vmatprep.subr.mxu0 %v298_v33  ;;  %525 = vmatprep.subr.mxu1 %v187_v49 }
  0x55   :  { %535 = vmatpush3.msra.mxu0 %v298_v33  ;;  %526 = vmatpush3.msra.mxu1 %v187_v49 }
  0x56   :  { %536 = vmatprep.subr.mxu0 %v297_v34  ;;  %527 = vmatprep.subr.mxu1 %v186_v51 }
  0x57   :  { %537 = vmatpush3.msra.mxu0 %v297_v34  ;;  %528 = vmatpush3.msra.mxu1 %v186_v51 }
  0x58   :  { %538 = vmatprep.subr.mxu0 %v296_v35 }
  0x59   :  { %539 = vmatpush3.msra.mxu0 %v296_v35 }
  0x5a   :  { %540 = vmatprep.subr.mxu0 %v295_v36 }
  0x5b   :  { %541 = vmatpush3.msra.mxu0 %v295_v36 }
  0x5c   :  { %542 = vmatprep.subr.mxu0 %v294_v37 }
  0x5d   :  { %543 = vmatpush3.msra.mxu0 %v294_v37 }
  0x5e   :  { %544 = vmatprep.subr.mxu0 %v293_v38 }
  0x5f   :  { %545 = vmatpush3.msra.mxu0 %v293_v38 }
  0x60   :  { %546 = vmatprep.subr.mxu0 %v292_v39 }
  0x61   :  { %547 = vmatpush3.msra.mxu0 %v292_v39 }
  0x62   :  { %548 = vmatprep.subr.mxu0 %v291_v40 }
  0x63   :  { %549 = vmatpush3.msra.mxu0 %v291_v40 }
  0x64   :  { %550 = vmatprep.subr.mxu0 %v290_v41 }
  0x65   :  { %551 = vmatpush3.msra.mxu0 %v290_v41 }
  0x66   :  { %552 = vmatprep.subr.mxu0 %v289_v42 }
  0x67   :  { %553 = vmatpush3.msra.mxu0 %v289_v42 }
  0x68   :  { %554 = vmatprep.subr.mxu0 %v288_v43 }
  0x69   :  { %555 = vmatpush3.msra.mxu0 %v288_v43 }
  0x6a   :  { %556 = vmatprep.subr.mxu0 %v287_v44 }
  0x6b   :  { %557 = vmatpush3.msra.mxu0 %v287_v44 }
  0x6c   :  { %558 = vmatprep.subr.mxu0 %v286_v46 }
  0x6d   :  { %559 = vmatpush3.msra.mxu0 %v286_v46 }
  0x6e   :  { %560 = vmatprep.subr.mxu0 %v285_v48 }
  0x6f   :  { %561 = vmatpush3.msra.mxu0 %v285_v48 }
  0x70   :  { %562 = vmatprep.subr.mxu0 %v284_v50 }
  0x71   :  { %563 = vmatpush3.msra.mxu0 %v284_v50 }
  0x72   :  { %565 = vmatmul.mubr.f32.vlgmr.msra.gmra.mxu0 %v756_v28 }
 0x112   :  { %v496_v53 = vpop.f32.mrf.mxu0 }
 0x113   :  { %v181_v54 = vadd.f32 %v496_v53, %v405_v52 }
 0x114   :  { %v175_v55 = vpop.f32.mrf.mxu0 }
 0x115   :  { %v176_v56 = vadd.f32 %v405_v52, %v175_v55  ;;  %v185_v58 = vmax.f32 %v181_v54, 0.0 }
 0x117   :  { %v184_v57 = vmax.f32 %v176_v56, 0.0 }
 0x119   :  { %529 = vmatprep.mubr.f32.mxu1 %v184_v57 }
 0x11a   :  { %530 = vmatmul.mubr.f32.vlgmr.msra.gmra.mxu1 %v185_v58 }
 0x132   :  { %v566_v59 = vpop.f32.mrf.mxu0 }
 0x133   :  { %v379_v62 = vadd.f32 %v566_v59, %v407_v60 }
 0x134   :  { %v373_v0 = vpop.f32.mrf.mxu0 }
 0x135   :  { %v374_v4 = vadd.f32 %v407_v60, %v373_v0 }
 0x1da   :  { %v531_v63 = vpop.f32.mrf.mxu1 }
 0x1db   :  { %v281_v1 = vadd.f32 %v531_v63, %v406_v61 }
 0x1dc   :  { %v275_v2 = vpop.f32.mrf.mxu1 }
 0x1dd   :  { %v383_v3 = vadd.f32 %v379_v62, %v281_v1  ;;  %v276_v5 = vadd.f32 %v406_v61, %v275_v2 }
 0x1df   :  { %385 = vst [vmem:[#allocation10 + $0x8] sm:$0xff] %v383_v3  ;;  %v382_v6 = vadd.f32 %v374_v4, %v276_v5 }
 0x1e1   :  { %384 = vst [vmem:[#allocation10] sm:$0xff] %v382_v6 }
 0x1e2   :  { %665 = shalt.err (!%p662_p10)
}
 0x1e3   :  { %397 = dma.vmem_to_hbm [thread:$0]  %s392_s25, 256, %s783_s7, [#allocation4], %s684_s29, %s684_s29, %s685_s30  }
 0x1e4   :  { %680 = dma.done.wait [#allocation4], 256  }
 0x1e5   :  { %681 = vsyncadd [#allocation4], 4294967040 }
 0x1e6   :  { %401 = vsyncpa [#allocation3], 1 }
 0x1e7   :  { %402 = vsyncpa [#allocation6], 1 }
 0x1e8   :  { %403 = vsyncpa [#allocation9], 1 }
 0x1e9   :  { %404 = vsyncpa [#allocation4], 1 }

</bundles_post_ra>
